<compile_context>
chip_gen: v7x
topology: tpu7x:2x2x1
jax: 0.10.0
libtpu: 0.0.40
codegen_flags: <defaults>
</compile_context>

<pallas_src>
import functools

import jax
import jax.numpy as jnp
from jax import lax
from jax.experimental import pallas as pl
from jax.experimental.pallas import tpu as pltpu

LANE = 128


def _sublane_multiple(dtype):
    """Native sublane packing multiple: f32 -> 8, bf16 -> 16, int8 -> 32."""
    return 8 * max(1, 4 // jnp.dtype(dtype).itemsize)


def _iou_kernel(x_ref, t_ref, out_ref, inter_acc, st_acc, *,
                total_rows, rows_tile, acc_rows):
    """One (sample n, feature row-block k) grid step.

    x_ref/t_ref : (1, rows_tile, 128) blocks of logits / one-hot target.
    out_ref     : (1, 1, 128) per-sample loss slab (value broadcast on lanes).
    inter_acc   : (acc_rows, 128) f32 partial sum of sigmoid(x) * t.
    st_acc      : (acc_rows, 128) f32 partial sum of sigmoid(x) + t.
    """
    k = pl.program_id(1)

    @pl.when(k == 0)
    def _():
        inter_acc[...] = jnp.zeros_like(inter_acc)
        st_acc[...] = jnp.zeros_like(st_acc)

    s = jax.nn.sigmoid(x_ref[0].astype(jnp.float32))       # (rows_tile, 128)
    t = t_ref[0].astype(jnp.float32)

    def accumulate(s_blk, t_blk):
        prod = s_blk * t_blk
        st = s_blk + t_blk                                  # union = st - inter later
        if acc_rows == rows_tile:
            inter_acc[...] += prod
            st_acc[...] += st
        else:
            # Per-step tree reduction into a small (8, 128) accumulator:
            # same add count, far less accumulator load/store traffic.
            inter_acc[...] += prod.reshape(-1, acc_rows, LANE).sum(axis=0)
            st_acc[...] += st.reshape(-1, acc_rows, LANE).sum(axis=0)

    if total_rows % rows_tile != 0:
        # Only the last row-block is ragged: keep every other step unmasked.
        last_k = pl.num_programs(1) - 1

        @pl.when(k != last_k)
        def _():
            accumulate(s, t)

        @pl.when(k == last_k)
        def _():
            row_ids = lax.broadcasted_iota(jnp.int32, (rows_tile, LANE), 0)
            valid = (row_ids + k * rows_tile) < total_rows
            # Mask BOTH s and t: union sums s by itself and OOB rows are garbage.
            accumulate(jnp.where(valid, s, 0.0), jnp.where(valid, t, 0.0))
    else:
        accumulate(s, t)

    @pl.when(k == pl.num_programs(1) - 1)
    def _():
        inter = jnp.sum(inter_acc[...], keepdims=True)      # (1, 1)
        union = jnp.sum(st_acc[...], keepdims=True) - inter # (1, 1)
        loss = 1.0 - inter / union                          # sigmoid>0 => union>0
        out_ref[...] = jnp.broadcast_to(loss, (1, 1, LANE))


def iou_loss_pallas(inputs, target_onehot, weight=None, *,
                    rows_per_block=None,
                    input_buffer_budget_bytes=6 * 1024 * 1024):
    """IoULoss.forward(inputs, target_oneHot, weight) -> scalar."""
    N = inputs.shape[0]
    D = 1
    for d in inputs.shape[1:]:
        D *= int(d)

    x = inputs.reshape(N, D)              # keep storage dtype; cast in-kernel
    t = target_onehot.reshape(N, D)

    # Only pad the D % 128 remainder: sentinel logits -> sigmoid == 0 and zero
    # targets, so padded lanes contribute nothing to inter or union.
    Dp = pl.cdiv(D, LANE) * LANE
    if Dp != D:
        x = jnp.pad(x, ((0, 0), (0, Dp - D)), constant_values=-1e9)
        t = jnp.pad(t, ((0, 0), (0, Dp - D)), constant_values=0)

    R = Dp // LANE
    x = x.reshape(N, R, LANE)             # metadata-only reshape, no HBM copy
    t = t.reshape(N, R, LANE)

    # Sublane alignment required by the narrowest dtype (f32:8, bf16:16, i8:32).
    m = max(_sublane_multiple(x.dtype), _sublane_multiple(t.dtype))

    if rows_per_block is None:
        # Size the tile so 2 inputs x 2 pipeline buffers stay within budget
        # (fits v5e's 16 MiB scoped default; big enough to amortize per-step
        # overhead on v6e/v7x now that the accumulators are tiny).
        bytes_per_row = LANE * (x.dtype.itemsize + t.dtype.itemsize)
        rows_per_block = input_buffer_budget_bytes // (2 * bytes_per_row)
    rows_per_block = max(m, (int(rows_per_block) // m) * m)
    rows_per_block = min(rows_per_block, 8192)

    # Full-extent block is always legal; partial blocks must be sublane-aligned.
    rows_tile = R if rows_per_block >= R else rows_per_block
    K = pl.cdiv(R, rows_tile)

    # Small accumulator when the tile allows the (-1, 8, 128) tree reshape.
    acc_rows = 8 if rows_tile % 8 == 0 else rows_tile

    kernel = functools.partial(_iou_kernel, total_rows=R, rows_tile=rows_tile,
                               acc_rows=acc_rows)

    out = pl.pallas_call(
        kernel,
        out_shape=jax.ShapeDtypeStruct((N, 1, LANE), jnp.float32),
        grid_spec=pltpu.PrefetchScalarGridSpec(
            num_scalar_prefetch=0,
            grid=(N, K),                                    # reduction axis last
            in_specs=[
                pl.BlockSpec((1, rows_tile, LANE), lambda n, k: (n, k, 0)),
                pl.BlockSpec((1, rows_tile, LANE), lambda n, k: (n, k, 0)),
            ],
            out_specs=pl.BlockSpec((1, 1, LANE), lambda n, k: (n, 0, 0)),
            scratch_shapes=[
                pltpu.VMEM((acc_rows, LANE), jnp.float32),   # sum(s * t)
                pltpu.VMEM((acc_rows, LANE), jnp.float32),   # sum(s + t)
            ],
        ),
        compiler_params=pltpu.CompilerParams(
            dimension_semantics=("parallel", "arbitrary"),   # batch ||, K reduce
        ),
    )(x, t)

    loss = out[:, 0, 0]                   # (N,) per-sample 1 - IoU
    if weight is not None:
        loss = loss * weight
    return jnp.sum(loss)


def _iou_loss_ref(inputs, target_onehot, weight=None):
    """Pure-JAX reference mirroring the PyTorch module."""
    N = inputs.shape[0]
    s = jax.nn.sigmoid(inputs.astype(jnp.float32))
    t = target_onehot.astype(jnp.float32)
    inter = (s * t).reshape(N, -1).sum(1)
    union = (s + t - s * t).reshape(N, -1).sum(1)
    loss = 1.0 - inter / union
    if weight is not None:
        loss = loss * weight
    return jnp.sum(loss)


if __name__ == "__main__":
    key = jax.random.PRNGKey(0)
    k1, k2 = jax.random.split(key)

    N, C, H, W = 2, 4, 16, 16
    inputs = jax.random.normal(k1, (N, C, H, W), dtype=jnp.float32)
    classes = jax.random.randint(k2, (N, H, W), 0, C)
    target_onehot = jax.nn.one_hot(classes, C, dtype=jnp.float32)   # (N,H,W,C)
    target_onehot = jnp.transpose(target_onehot, (0, 3, 1, 2))      # (N,C,H,W)

    # f32 logits + f32 one-hot
    loss = jax.block_until_ready(iou_loss_pallas(inputs, target_onehot))
    ref = _iou_loss_ref(inputs, target_onehot)
    assert jnp.allclose(loss, ref, rtol=1e-5, atol=1e-5), (loss, ref)

    # int8 one-hot target (recommended: 4x fewer target HBM bytes)
    target_i8 = target_onehot.astype(jnp.int8)
    loss_i8 = jax.block_until_ready(iou_loss_pallas(inputs, target_i8))
    assert jnp.allclose(loss_i8, ref, rtol=1e-5, atol=1e-5), (loss_i8, ref)

    # bf16 logits + int8 targets (narrow storage, f32 compute inside kernel)
    x_bf16 = inputs.astype(jnp.bfloat16)
    loss_b = jax.block_until_ready(iou_loss_pallas(x_bf16, target_i8))
    ref_b = _iou_loss_ref(x_bf16, target_onehot)
    assert jnp.allclose(loss_b, ref_b, rtol=1e-4, atol=1e-4), (loss_b, ref_b)

    # weighted variant
    w = jnp.array([0.25, 0.75], dtype=jnp.float32)
    loss_w = jax.block_until_ready(iou_loss_pallas(inputs, target_onehot, w))
    ref_w = _iou_loss_ref(inputs, target_onehot, w)
    assert jnp.allclose(loss_w, ref_w, rtol=1e-5, atol=1e-5), (loss_w, ref_w)

    # multi-step reduction with a ragged last row-block (masked fast/slow split)
    inputs2 = jax.random.normal(k1, (N, C, 24, 24), dtype=jnp.float32)
    classes2 = jax.random.randint(k2, (N, 24, 24), 0, C)
    target2 = jnp.transpose(jax.nn.one_hot(classes2, C, dtype=jnp.float32),
                            (0, 3, 1, 2))
    loss_r = jax.block_until_ready(
        iou_loss_pallas(inputs2, target2, rows_per_block=8))   # R=18 -> K=3, ragged
    ref_r = _iou_loss_ref(inputs2, target2)
    assert jnp.allclose(loss_r, ref_r, rtol=1e-5, atol=1e-5), (loss_r, ref_r)

    print("KERNEL_OK")
</pallas_src>

<mosaic_0001>
module attributes {stable_mosaic.version = 11 : i64} {
  func.func @_iou_kernel(%arg0: i32, %arg1: i32, %arg2: memref<1x8x128xf32, #tpu.memory_space<vmem>>, %arg3: memref<1x8x128xf32, #tpu.memory_space<vmem>>, %arg4: memref<1x1x128xf32, #tpu.memory_space<vmem>>, %arg5: memref<8x128xf32, #tpu.memory_space<vmem>>, %arg6: memref<8x128xf32, #tpu.memory_space<vmem>>) attributes {dimension_semantics = [#tpu.dimension_semantics<parallel>, #tpu.dimension_semantics<arbitrary>], iteration_bounds = array<i64: 2, 1>, scalar_prefetch = 0 : i64, scratch_operands = 2 : i64, tpu.core_type = #tpu.core_type<tc>, window_params = [{transform_indices = @transform_0, window_bounds = array<i64: 1, 8, 128>}, {transform_indices = @transform_1, window_bounds = array<i64: 1, 8, 128>}, {transform_indices = @transform_2, window_bounds = array<i64: 1, 1, 128>}]} {
    %c0_i32 = arith.constant 0 : i32
    %0 = arith.cmpi eq, %arg1, %c0_i32 : i32
    %1 = arith.extui %0 : i1 to i32
    %c0_i32_0 = arith.constant 0 : i32
    %2 = arith.cmpi ne, %1, %c0_i32_0 : i32
    scf.if %2 {
      %cst_16 = arith.constant 0.000000e+00 : f32
      %23 = vector.broadcast %cst_16 : f32 to vector<8x128xf32>
      %c0_17 = arith.constant 0 : index
      %c0_18 = arith.constant 0 : index
      %24 = vector.load %arg5[%c0_17, %c0_18] : memref<8x128xf32, #tpu.memory_space<vmem>>, vector<8x128xf32>
      tpu.vector_store %arg5[%c0_17, %c0_18], %23 {strides = array<i32>} : memref<8x128xf32, #tpu.memory_space<vmem>>, vector<8x128xf32>,
      %cst_19 = arith.constant 0.000000e+00 : f32
      %25 = vector.broadcast %cst_19 : f32 to vector<8x128xf32>
      %c0_20 = arith.constant 0 : index
      %c0_21 = arith.constant 0 : index
      %26 = vector.load %arg6[%c0_20, %c0_21] : memref<8x128xf32, #tpu.memory_space<vmem>>, vector<8x128xf32>
      tpu.vector_store %arg6[%c0_20, %c0_21], %25 {strides = array<i32>} : memref<8x128xf32, #tpu.memory_space<vmem>>, vector<8x128xf32>,
    } else {
    }
    %c0 = arith.constant 0 : index
    %c0_1 = arith.constant 0 : index
    %c0_2 = arith.constant 0 : index
    %3 = vector.load %arg2[%c0, %c0_1, %c0_2] : memref<1x8x128xf32, #tpu.memory_space<vmem>>, vector<1x8x128xf32>
    %4 = vector.shape_cast %3 : vector<1x8x128xf32> to vector<8x128xf32>
    %5 = arith.negf %4 : vector<8x128xf32>
    %6 = math.exp %5 : vector<8x128xf32>
    %cst = arith.constant 1.000000e+00 : f32
    %7 = vector.broadcast %cst : f32 to vector<8x128xf32>
    %8 = arith.addf %7, %6 : vector<8x128xf32>
    %9 = arith.divf %7, %8 : vector<8x128xf32>
    %c0_3 = arith.constant 0 : index
    %c0_4 = arith.constant 0 : index
    %c0_5 = arith.constant 0 : index
    %10 = vector.load %arg3[%c0_3, %c0_4, %c0_5] : memref<1x8x128xf32, #tpu.memory_space<vmem>>, vector<1x8x128xf32>
    %11 = vector.shape_cast %10 : vector<1x8x128xf32> to vector<8x128xf32>
    %12 = arith.mulf %9, %11 : vector<8x128xf32>
    %13 = arith.addf %9, %11 : vector<8x128xf32>
    %c0_6 = arith.constant 0 : index
    %c0_7 = arith.constant 0 : index
    %14 = vector.load %arg5[%c0_6, %c0_7] : memref<8x128xf32, #tpu.memory_space<vmem>>, vector<8x128xf32>
    %15 = arith.addf %14, %12 : vector<8x128xf32>
    %c0_8 = arith.constant 0 : index
    %c0_9 = arith.constant 0 : index
    %16 = vector.load %arg5[%c0_8, %c0_9] : memref<8x128xf32, #tpu.memory_space<vmem>>, vector<8x128xf32>
    tpu.vector_store %arg5[%c0_8, %c0_9], %15 {strides = array<i32>} : memref<8x128xf32, #tpu.memory_space<vmem>>, vector<8x128xf32>,
    %c0_10 = arith.constant 0 : index
    %c0_11 = arith.constant 0 : index
    %17 = vector.load %arg6[%c0_10, %c0_11] : memref<8x128xf32, #tpu.memory_space<vmem>>, vector<8x128xf32>
    %18 = arith.addf %17, %13 : vector<8x128xf32>
    %c0_12 = arith.constant 0 : index
    %c0_13 = arith.constant 0 : index
    %19 = vector.load %arg6[%c0_12, %c0_13] : memref<8x128xf32, #tpu.memory_space<vmem>>, vector<8x128xf32>
    tpu.vector_store %arg6[%c0_12, %c0_13], %18 {strides = array<i32>} : memref<8x128xf32, #tpu.memory_space<vmem>>, vector<8x128xf32>,
    %c0_i32_14 = arith.constant 0 : i32
    %20 = arith.cmpi eq, %arg1, %c0_i32_14 : i32
    %21 = arith.extui %20 : i1 to i32
    %c0_i32_15 = arith.constant 0 : i32
    %22 = arith.cmpi ne, %21, %c0_i32_15 : i32
    scf.if %22 {
      %c0_16 = arith.constant 0 : index
      %c0_17 = arith.constant 0 : index
      %23 = vector.load %arg5[%c0_16, %c0_17] : memref<8x128xf32, #tpu.memory_space<vmem>>, vector<8x128xf32>
      %24 = vector.shape_cast %23 : vector<8x128xf32> to vector<1x8x128xf32>
      %cst_18 = arith.constant dense<0.000000e+00> : vector<1xf32>
      %25 = vector.multi_reduction <add>, %24, %cst_18 [1, 2] : vector<1x8x128xf32> to vector<1xf32>
      %26 = vector.shape_cast %25 : vector<1xf32> to vector<1x1x1xf32>
      %27 = vector.extract %26[0, 0, 0] : f32 from vector<1x1x1xf32>
      %28 = vector.broadcast %27 : f32 to vector<1x1xf32>
      %c0_19 = arith.constant 0 : index
      %c0_20 = arith.constant 0 : index
      %29 = vector.load %arg6[%c0_19, %c0_20] : memref<8x128xf32, #tpu.memory_space<vmem>>, vector<8x128xf32>
      %30 = vector.shape_cast %29 : vector<8x128xf32> to vector<1x8x128xf32>
      %cst_21 = arith.constant dense<0.000000e+00> : vector<1xf32>
      %31 = vector.multi_reduction <add>, %30, %cst_21 [1, 2] : vector<1x8x128xf32> to vector<1xf32>
      %32 = vector.shape_cast %31 : vector<1xf32> to vector<1x1x1xf32>
      %33 = vector.extract %32[0, 0, 0] : f32 from vector<1x1x1xf32>
      %34 = vector.broadcast %33 : f32 to vector<1x1xf32>
      %35 = arith.subf %34, %28 : vector<1x1xf32>
      %36 = arith.divf %28, %35 : vector<1x1xf32>
      %cst_22 = arith.constant 1.000000e+00 : f32
      %37 = vector.broadcast %cst_22 : f32 to vector<1x1xf32>
      %38 = arith.subf %37, %36 : vector<1x1xf32>
      %39 = vector.shape_cast %38 : vector<1x1xf32> to vector<1x1x1xf32>
      %40 = vector.broadcast %39 : vector<1x1x1xf32> to vector<1x1x128xf32>
      %c0_23 = arith.constant 0 : index
      %c0_24 = arith.constant 0 : index
      %c0_25 = arith.constant 0 : index
      %41 = vector.load %arg4[%c0_23, %c0_24, %c0_25] : memref<1x1x128xf32, #tpu.memory_space<vmem>>, vector<1x1x128xf32>
      tpu.vector_store %arg4[%c0_23, %c0_24, %c0_25], %40 {strides = array<i32>} : memref<1x1x128xf32, #tpu.memory_space<vmem>>, vector<1x1x128xf32>,
    } else {
    }
    return
  }
  func.func @transform_0(%arg0: i32, %arg1: i32) -> (i32, i32, i32) {
    %c0_i32 = arith.constant 0 : i32
    %c0_i32_0 = arith.constant 0 : i32
    return %arg0, %arg1, %c0_i32 : i32, i32, i32
  }
  func.func @transform_1(%arg0: i32, %arg1: i32) -> (i32, i32, i32) {
    %c0_i32 = arith.constant 0 : i32
    %c0_i32_0 = arith.constant 0 : i32
    return %arg0, %arg1, %c0_i32 : i32, i32, i32
  }
  func.func @transform_2(%arg0: i32, %arg1: i32) -> (i32, i32, i32) {
    %c0_i32 = arith.constant 0 : i32
    %c0_i32_0 = arith.constant 0 : i32
    %c0_i32_1 = arith.constant 0 : i32
    return %arg0, %c0_i32, %c0_i32_0 : i32, i32, i32
  }
}

</mosaic_0001>

<bundles_post_ra>
// kernel: tpu_custom_call.1
= control target key start
LH: loop header
LB: loop body
LE: loop exit
PB: predicated region body
PF: predicated region fallthrough
CT: control target
= control target key end

     0   :  { %7 = vsyncpa [#allocation5], 0  ;;  %s856_s0 = inlined_call_operand.hbm [shape: f32[2,8,128], index: 0, kind: input, shape index: {}]   ;;  %s857_s1 = inlined_call_operand.hbm [shape: f32[2,8,128], index: 1, kind: input, shape index: {}]   ;;  %s858_s2 = inlined_call_operand.hbm [shape: f32[2,1,128], index: 2, kind: output, shape index: {}]  }
   0x1   :  { %9 = vsyncpa [#allocation5 + $0x1], 0 }
   0x2   :  { %10 = vsyncpa [#allocation8], 0 }
   0x3   :  { %12 = vsyncpa [#allocation8 + $0x1], 0 }
   0x4   :  { %13 = vsyncpa [#allocation6], 0 }
   0x5   :  { %15 = vsyncpa [#allocation6 + $0x1], 0  ;;  %s635_s9 = smov 0   ;;  %s637_s10 = smov 0  }
   0x6   :  { %s639_s11 = smov 0   ;;  %s641_s12 = smov 0  }
   0x7   :  { %s643_s13 = smov 0   ;;  %s645_s14 = smov 0  }
   0x8 LB: > { %s377_s15 = sadd.s32 4294967295, %s615_s14   ;;  %s378_s16 = sadd.s32 4294967294, %s615_s14   ;;  %s615_s14 = sphi %s645_s14, %s21_s14   ;;  %s611_s13 = sphi %s643_s13, %s878_s13   ;;  %s607_s12 = sphi %s641_s12, %s877_s12   ;;  %s603_s11 = sphi %s639_s11, %s876_s11   ;;  %s599_s10 = sphi %s637_s10, %s875_s10   ;;  %s595_s9 = sphi %s635_s9, %s874_s9  }
   0x9   : > { %s33_s17 = sadd.s32 1, %s611_s13  ;;  %s42_s18 = sadd.s32 1, %s603_s11 }
   0xa   : > { %p35_p0 = scmp.ge.s32.totalorder %s33_s17, 2  ;;  %p49_p1 = scmp.ne.s32.totalorder %s603_s11, %s599_s10 }
   0xb   : > { %p50_p2 = scmp.eq.s32.totalorder %s615_s14, 0  ;;  %p55_p3 = scmp.ne.s32.totalorder %s599_s10, %s595_s9 }
   0xc   : > { %s880_s17 = smov (%p35_p0, %s33_s17), 0  ;;  %p56_p5 = scmp.eq.s32.totalorder %s377_s15, 0 }
   0xd   : > { %p676_p4 = por %p50_p2, %p49_p1  ;;  %s37_s20 = ssub.s32 %s611_s13, %s880_s17 }
   0xe   : > { %p107_p6 = scmp.eq.s32.totalorder %s377_s15, 1  ;;  %p40_p7 = scmp.eq.s32.totalorder %s37_s20, 0 }
   0xf   : > { %p682_p8 = por %p56_p5, %p55_p3  ;;  %p113_p10 = scmp.eq.s32.totalorder %s378_s16, 1 }
  0x10   : > { %p686_p9 = por %p107_p6, %p49_p1  ;;  %p413_p13 = scmp.lt.s32.totalorder %s615_s14, 2 }
  0x11   : > { %s862_s21 = scalar_select %p682_p8, 1, 0 }
  0x12   : > { %s863_s22 = scalar_select %p686_p9, 1, 0 }
  0x13   : > { %s691_s23 = scalar_select %p40_p7, %s603_s11, %s42_s18  }
  0x14   : > { %p693_p11 = por %p113_p10, %p55_p3  ;;  %s700_s25 = sand.u32 1, %s603_s11  }
  0x15   : > { %s381_s26 = sshll.u32 %s700_s25, 3  ;;  %s382_s27 = sshll.u32 %s611_s13, 7 }
  0x16   : > { %s864_s24 = scalar_select %p693_p11, 1, 0 }
  0x17   : > { %s709_s30 = scalar_lea.hbm %s856_s0, %s382_s27  ;;  %s137_s3 = scalar_lea.vmem [#allocation4], %s381_s26 }
  0x18   : > { %s145_s4 = sshll.u32 %s137_s3, 4  ;;  %p717_p0 = pnand %p413_p13, %p676_p4  ;;  %s713_s4 = int_to_ptr.vmem [resolvable:$true] %s145_s4 }
  0x19   : > { %s134_s6 = scalar_lea.sflag [#allocation5], %s700_s25  ;;  %s469_s7 = scalar_lea.hbm %s709_s30, 128 }
  0x1a   : > { %p470_p3 = scmp.ne.s32.totalorder %s709_s30, %s469_s7  ;;  %p471_p5 = pneg %p717_p0 }
  0x1b   : > { %s474_s16 = scalar_lea.hbm %s856_s0, 256  ;;  %p475_p4 = scmp.lt.u32.totalorder %s709_s30, %s856_s0 }
  0x1c   : > { %p472_p6 = pnand %p471_p5, %p470_p3  ;;  %p476_p10 = scmp.lt.u32.totalorder %s474_s16, %s469_s7 }
  0x1d   : > { %p478_p12 = scmp.lt.u32.totalorder %s469_s7, %s709_s30 }
  0x1e   : > { %p473_p7 = pneg %p472_p6  ;;  %p477_p13 = por %p476_p10, %p475_p4 }
  0x20   : > { %p479_p1 = por %p478_p12, %p477_p13 }
  0x22   : > { %p480_p2 = pnand %p479_p1, %p473_p7 }
  0x24   : > { %483 = shalt.err (!%p480_p2)
}
  0x25   : > { %s484_s20 = scalar_lea.vmem %s713_s4, 128  ;;  %s617_s28 = smov [#allocation4]  }
  0x26   : > { %p485_p3 = scmp.ne.s32.totalorder %s713_s4, %s484_s20  ;;  %s489_s29 = sshll.u32 %s617_s28, 4  ;;  %s490_s29 = int_to_ptr.vmem [resolvable:$false] %s489_s29 }
  0x27   : > { %s491_s3 = scalar_lea.vmem %s490_s29, 256  ;;  %p492_p9 = scmp.lt.s32.totalorder %s713_s4, %s490_s29 }
  0x28   : > { %p487_p6 = pnand %p485_p3, %p471_p5  ;;  %p493_p4 = scmp.lt.s32.totalorder %s491_s3, %s484_s20 }
  0x2a   : > { %p488_p11 = pneg %p487_p6  ;;  %p494_p10 = por %p493_p4, %p492_p9 }
  0x2c   : > { %p495_p12 = pnand %p494_p10, %p488_p11 }
  0x2e   : > { %498 = shalt.err (!%p495_p12)
}
  0x2f   : > { %405 = dma.hbm_to_vmem [thread:$0]  (!%p717_p0), %s709_s30, 128, %s713_s4, %s134_s6  }
  0x30   : > { %p866_p1 = scmp.lt.s32.totalorder %s615_s14, 3  ;;  %p867_p2 = scmp.ge.s32.totalorder %s615_s14, 1 }
  0x31   : > { %s762_s16 = scalar_lea.hbm %s857_s1, %s382_s27  ;;  %s156_s18 = scalar_lea.vmem [#allocation7], %s381_s26 }
  0x32   : > { %p753_p7 = pnand %p867_p2, %p866_p1  ;;  %s164_s19 = sshll.u32 %s156_s18, 4  ;;  %s165_s19 = int_to_ptr.vmem [resolvable:$true] %s164_s19 }
  0x33   : > { %s153_s30 = scalar_lea.sflag [#allocation8], %s700_s25  ;;  %s499_s4 = scalar_lea.hbm %s762_s16, 128 }
  0x34   : > { %s868_s7 = scalar_select %p753_p7, 1, 0 }
  0x35   : > { %p500_p9 = scmp.ne.s32.totalorder %s762_s16, %s499_s4  ;;  %s504_s27 = scalar_lea.hbm %s857_s1, 256 }
  0x36   : > { %p505_p3 = scmp.lt.u32.totalorder %s762_s16, %s857_s1  ;;  %p506_p6 = scmp.lt.u32.totalorder %s504_s27, %s499_s4 }
  0x37   : > { %p502_p11 = pnand %p500_p9, %p471_p5  ;;  %p508_p10 = scmp.lt.u32.totalorder %s499_s4, %s762_s16 }
  0x38   : > { %p507_p4 = por %p506_p6, %p505_p3 }
  0x39   : > { %p503_p13 = pneg %p502_p11 }
  0x3a   : > { %p509_p12 = por %p508_p10, %p507_p4 }
  0x3c   : > { %p510_p1 = pnand %p509_p12, %p503_p13 }
  0x3e   : > { %513 = shalt.err (!%p510_p1)
}
  0x3f   : > { %s514_s25 = scalar_lea.vmem %s165_s19, 128  ;;  %s618_s26 = smov [#allocation7]  }
  0x40   : > { %p515_p2 = scmp.ne.s32.totalorder %s165_s19, %s514_s25  ;;  %s519_s3 = sshll.u32 %s618_s26, 4  ;;  %s520_s3 = int_to_ptr.vmem [resolvable:$false] %s519_s3 }
  0x41   : > { %s521_s8 = scalar_lea.vmem %s520_s3, 256  ;;  %p522_p8 = scmp.lt.s32.totalorder %s165_s19, %s520_s3 }
  0x42   : > { %p517_p9 = pnand %p515_p2, %p471_p5  ;;  %p523_p7 = scmp.lt.s32.totalorder %s521_s8, %s514_s25 }
  0x44   : > { %p518_p11 = pneg %p517_p9  ;;  %p524_p3 = por %p523_p7, %p522_p8 }
  0x46   : > { %p525_p6 = pnand %p524_p3, %p518_p11 }
  0x48   : > { %528 = shalt.err (!%p525_p6)
}
  0x49   : > { %408 = dma.hbm_to_vmem [thread:$0]  (!%p717_p0), %s762_s16, 128, %s165_s19, %s153_s30  }
  0x4a   : > { %p869_p13 = scmp.ne.s32.totalorder %s868_s7, 0 }
  0x4b   : > { %s789_s15 = sand.u32 (!%p869_p13), 1, %s599_s10   ;;  %p870_p5 = scmp.ne.s32.totalorder (!%p869_p13), %s862_s21, 0 }
  0x4c   : > { %173 = sbr.rel (%p869_p13) target bundleno = 355 (0x163), region = 28  ;;  %s386_s18 = sshll.u32 (!%p869_p13), %s789_s15, 3 }
  0x4d   : > { %s176_s4 = scalar_lea.sflag (!%p869_p13), [#allocation5], %s789_s15  ;;  %s179_s6 = scalar_lea.vmem (!%p869_p13), [#allocation4], %s386_s18 }
  0x53   : > { %582 = dma.done.wait (%p870_p5), %s176_s4, 128  }
  0x54   : > { %584 = vsyncadd (%p870_p5), %s176_s4, 4294967168  ;;  %s185_s5 = scalar_lea.sflag [#allocation8], %s789_s15  ;;  %s188_s16 = scalar_lea.vmem [#allocation7], %s386_s18 }
  0x55   : > { %586 = dma.done.wait (%p870_p5), %s185_s5, 128  }
  0x56   : > { %588 = vsyncadd (%p870_p5), %s185_s5, 4294967168  ;;  %v219_v0 = vld [vmem:[%s179_s6] sm:$0xff]  ;;  %v226_v4 = vld [vmem:[%s188_s16] sm:$0xff]  ;;  %s389_s19 = sshll.u32 %s607_s12, 4  ;;  %s212_s30 = scalar_lea.vmem [#allocation9], %s789_s15 }
  0x57   : > { %v388_v1 = vmul.f32 -1.442695, %v219_v0  ;;  %s278_s20 = sshll.u32 %s212_s30, 4  ;;  %s807_s29 = scalar_lea.hbm %s858_s2, %s389_s19  ;;  %s809_s20 = int_to_ptr.vmem [resolvable:$true] %s278_s20 }
  0x58   : > { %s266_s25 = scalar_lea.sflag [#allocation6], %s789_s15  ;;  %s529_s26 = scalar_lea.vmem %s809_s20, 16 }
  0x59   : > { %463 = vpow2.f32 %v388_v1  ;;  %p530_p8 = scmp.ne.s32.totalorder %s809_s20, %s529_s26  ;;  %p871_p0 = scmp.ne.s32.totalorder %s863_s22, 0 }
  0x5a   : > { %s619_s12 = smov [#allocation9]  }
  0x5b   : > { %p531_p7 = pnand %p530_p8, %p871_p0  ;;  %s533_s3 = sshll.u32 %s619_s12, 4  ;;  %s534_s3 = int_to_ptr.vmem [resolvable:$false] %s533_s3 }
  0x5c   : > { %s535_s8 = scalar_lea.vmem %s534_s3, 32  ;;  %p536_p10 = scmp.lt.s32.totalorder %s809_s20, %s534_s3 }
  0x5d   : > { %p532_p4 = pneg %p531_p7  ;;  %p537_p12 = scmp.lt.s32.totalorder %s535_s8, %s529_s26 }
  0x5f   : > { %p538_p1 = por %p537_p12, %p536_p10 }
  0x61   : > { %p539_p2 = pnand %p538_p1, %p532_p4 }
  0x63   : > { %v464_v2 = vpop.eup %463 }
  0x64   : > { %v223_v3 = vadd.f32 1.0, %v464_v2 }
  0x66   : > { %465 = vrcp.f32 %v223_v3 }
  0x70   : > { %v466_v5 = vpop.eup %465 }
  0x71   : > { %v227_v6 = vmul.f32 %v466_v5, %v226_v4  ;;  %v228_v7 = vadd.f32 %v466_v5, %v226_v4 }
  0x73   : > { %239 = vadd.xlane.f32.xlu0 %v227_v6 }
  0x77   : > { %250 = vadd.xlane.f32.xlu0 %v228_v7 }
 0x100   : > { %v240_v8 = vpop.xlane.xlu0 %239 }
 0x101   : > { %v241_v9 = vrot.slane %v240_v8, 4 }
 0x103   : > { %v242_v10 = vadd.f32 %v241_v9, %v240_v8 }
 0x104   : > { %v251_v11 = vpop.xlane.xlu0 %250 }
 0x105   : > { %v243_v12 = vrot.slane %v242_v10, 2  ;;  %v252_v13 = vrot.slane %v251_v11, 4 }
 0x107   : > { %v253_v14 = vadd.f32 %v252_v13, %v251_v11  ;;  %v244_v15 = vadd.f32 %v243_v12, %v242_v10 }
 0x109   : > { %v254_v16 = vrot.slane %v253_v14, 2  ;;  %v245_v17 = vrot.slane %v244_v15, 1 }
 0x10b   : > { %v255_v18 = vadd.f32 %v254_v16, %v253_v14  ;;  %v246_v19 = vadd.f32 %v245_v17, %v244_v15 }
 0x10d   : > { %392 = vpush %v246_v19  ;;  %v256_v20 = vrot.slane %v255_v18, 1 }
 0x10f   : > { %v257_v21 = vadd.f32 %v256_v20, %v255_v18 }
 0x111   : > { %394 = vpush %v257_v21 }
 0x13e   : > { %s393_s21 = spop %392 }
 0x13f   : > { %v248_v22 = vstv %s393_s21 }
 0x142   : > { %s395_s7 = spop %394 }
 0x143   : > { %v259_v23 = vstv %s395_s7 }
 0x144   : > { %v260_v24 = vsub.f32 %v259_v23, %v248_v22 }
 0x146   : > { %467 = vrcp.f32 %v260_v24 }
 0x150   : > { %v468_v25 = vpop.eup %467 }
 0x151   : > { %v262_v26 = vmul.f32 %v468_v25, %v248_v22 }
 0x153   : > { %v263_v27 = vsub.f32 1.0, %v262_v26 }
 0x155   : > { %264 = vst [vmem:[%s212_s30] sm:$0x1] %v263_v27 }
 0x156   : > { %542 = shalt.err (!%p539_p2)
}
 0x157   : > { %s543_s15 = scalar_lea.hbm %s807_s29, 16  ;;  %s547_s6 = scalar_lea.hbm %s858_s2, 32 }
 0x158   : > { %p544_p9 = scmp.ne.s32.totalorder %s807_s29, %s543_s15  ;;  %p548_p6 = scmp.lt.u32.totalorder %s807_s29, %s858_s2 }
 0x159   : > { %p549_p13 = scmp.lt.u32.totalorder %s547_s6, %s543_s15  ;;  %p551_p8 = scmp.lt.u32.totalorder %s543_s15, %s807_s29 }
 0x15a   : > { %p545_p11 = pnand %p544_p9, %p871_p0 }
 0x15b   : > { %p550_p5 = por %p549_p13, %p548_p6 }
 0x15c   : > { %p546_p3 = pneg %p545_p11 }
 0x15d   : > { %p552_p7 = por %p551_p8, %p550_p5 }
 0x15f   : > { %p553_p4 = pnand %p552_p7, %p546_p3 }
 0x161   : > { %556 = shalt.err (!%p553_p4)
}
 0x162   : > { %400 = dma.vmem_to_hbm [thread:$0]  (%p871_p0), %s809_s20, 16, %s807_s29, %s266_s25  }
 0x163 PF: > { %s290_s21 = sand.u32 1, %s595_s9   ;;  %p872_p10 = scmp.ne.s32.totalorder %s864_s24, 0 }
 0x164   : > { %p873_p12 = scmp.ge.s32.totalorder %s615_s14, 2  ;;  %s291_s7 = scalar_lea.sflag [#allocation6], %s290_s21 }
 0x166   : > { %p410_p1 = pnand %p873_p12, %p872_p10 }
 0x168   : > { %590 = dma.done.wait (!%p410_p1), %s291_s7, 16  }
 0x169   : > { %592 = vsyncadd (!%p410_p1), %s291_s7, 4294967280  ;;  %s21_s14 = sadd.s32 1, %s615_s14   ;;  %s874_s9 = smov %s599_s10 }
 0x16a   : > { %p18_p2 = scmp.ge.s32.totalorder %s21_s14, 4   ;;  %s875_s10 = smov %s603_s11 }
 0x16b   : > { %s876_s11 = smov %s691_s23  ;;  %s877_s12 = smov %s611_s13 }
 0x16c   : > { %s878_s13 = smov %s880_s17  ;;  %20 = sbr.rel (!%p18_p2) target bundleno = 8 (0x8), region = 94 }
 0x173   :  { %295 = vsyncpa [#allocation5], 1 }
 0x174   :  { %297 = vsyncpa [#allocation5 + $0x1], 1 }
 0x175   :  { %298 = vsyncpa [#allocation8], 1 }
 0x176   :  { %300 = vsyncpa [#allocation8 + $0x1], 1 }
 0x177   :  { %301 = vsyncpa [#allocation6], 1 }
 0x178   :  { %303 = vsyncpa [#allocation6 + $0x1], 1 }

</bundles_post_ra>
